<compile_context>
chip_gen: v5e
topology: v5e:2x2
jax: 0.10.0
libtpu: 0.0.40
codegen_flags: <defaults>
</compile_context>

<pallas_src>
import math

import jax
import jax.numpy as jnp
from jax import lax
from jax.experimental import pallas as pl
from jax.experimental.pallas import tpu as pltpu

# Exact f32 matmuls for the plain-JAX references (TPU default precision would
# otherwise quantize the reference itself and blur the correctness checks).
jax.config.update("jax_default_matmul_precision", "highest")


# ---------------------------------------------------------------------------
# VMEM budgeting (generation-aware: ~48 MiB limit on v7x's 64 MiB VMEM,
# ~96 MiB on v5e/v6e's 128 MiB).
# ---------------------------------------------------------------------------
_MAX_ROW_TILE = 2048                   # cap on rows per grid step


def _round_up(x, m):
    return ((x + m - 1) // m) * m


def _vmem_budget():
    """(tile working-set budget, scoped vmem_limit_bytes) for this chip."""
    cap = 64 * 1024 * 1024
    try:
        info = pltpu.get_tpu_info()
        cap = int(getattr(info, "vmem_capacity_bytes", cap)) or cap
    except Exception:
        pass
    limit = min((cap * 3) // 4, 100 * 1024 * 1024)
    budget = (limit * 2) // 3
    return budget, limit


def _auto_row_tile(n_rows, per_row_bytes, fixed_bytes, sub, budget):
    """Largest row tile (multiple of `sub`, <=_MAX_ROW_TILE) fitting budget."""
    avail = max(budget - fixed_bytes, sub * per_row_bytes)
    tm = min(_MAX_ROW_TILE, avail // max(per_row_bytes, 1), _round_up(n_rows, sub))
    return max(sub, (int(tm) // sub) * sub)


def _sublane_multiple(dtype):
    # f32 -> 8, bf16 -> 16, int8/fp8 -> 32 (sublane packing).
    return max(8, 32 // jnp.dtype(dtype).itemsize)


# ---------------------------------------------------------------------------
# 1) Linear / GraphConv dense feature transform (nn.Linear semantics)
# ---------------------------------------------------------------------------
def _linear_kernel(x_ref, w_ref, b_ref, o_ref):
    # x_ref: (TM, hid); w_ref: (hid, out_pad) — pre-transposed in the wrapper
    # so the contraction is a plain (1,0) matmul (no per-step transpose).
    acc = jnp.dot(x_ref[...], w_ref[...], preferred_element_type=jnp.float32)
    acc = acc + b_ref[...].astype(jnp.float32)      # (1, out_pad) broadcasts
    o_ref[...] = acc.astype(o_ref.dtype)


def linear_forward(x, weight, bias, *, stream_dtype=jnp.bfloat16, row_tile=None):
    """y = x @ weight.T + bias  (PyTorch nn.Linear forward).

    x:      [N, hid]
    weight: [out_dim, hid]   (native PyTorch layout)
    bias:   [out_dim]
    stream_dtype: dtype used to stream x / hold the weight (bf16 default,
                  f32 for exact semantics); accumulation is always f32.
    """
    n, hid = x.shape
    out_dim, hid_w = weight.shape
    assert hid_w == hid
    s_bytes = jnp.dtype(stream_dtype).itemsize
    sub = _sublane_multiple(stream_dtype)
    out_bytes = jnp.dtype(x.dtype).itemsize

    # Pad the class dimension to a 128-lane multiple for unmasked stores;
    # padded weight rows / bias cols are zero and sliced away, so numerics
    # are exact.  Pre-transpose the weight ONCE (wrapper-side XLA op).
    out_pad = _round_up(out_dim, 128)
    w_p = jnp.pad(weight, ((0, out_pad - out_dim), (0, 0))).T.astype(stream_dtype)
    b_p = jnp.pad(bias.reshape(1, out_dim),
                  ((0, 0), (0, out_pad - out_dim))).astype(jnp.float32)
    x_s = x.astype(stream_dtype)

    budget, limit = _vmem_budget()
    if row_tile is None:
        # Pallas double-buffers everything (including the resident weight),
        # so budget 2x for weight/bias as well.
        fixed = 2 * hid * out_pad * s_bytes + 2 * out_pad * 4
        per_row = 2 * hid * s_bytes + 2 * out_pad * out_bytes
        tm = _auto_row_tile(n, per_row, fixed, sub, budget)
    else:
        tm = _round_up(int(row_tile), sub)

    # TODO(synk): for large heads (out_pad*hid beyond a few MiB) add an
    # output-tile grid axis so the weight is not one resident block.

    n_pad = _round_up(n, tm)
    x_p = x_s if n_pad == n else jnp.pad(x_s, ((0, n_pad - n), (0, 0)))

    grid = (n_pad // tm,)
    cost = pl.CostEstimate(
        flops=2 * n_pad * hid * out_pad,
        transcendentals=0,
        bytes_accessed=n_pad * hid * s_bytes + n_pad * out_pad * out_bytes
        + int(w_p.nbytes) + int(b_p.nbytes),
    )

    y = pl.pallas_call(
        _linear_kernel,
        out_shape=jax.ShapeDtypeStruct((n_pad, out_pad), x.dtype),
        grid_spec=pltpu.PrefetchScalarGridSpec(
            num_scalar_prefetch=0,
            grid=grid,
            in_specs=[
                pl.BlockSpec((tm, hid), lambda i: (i, 0)),        # streamed rows
                pl.BlockSpec((hid, out_pad), lambda i: (0, 0)),   # resident weight
                pl.BlockSpec((1, out_pad), lambda i: (0, 0)),     # resident bias row
            ],
            out_specs=pl.BlockSpec((tm, out_pad), lambda i: (i, 0)),
        ),
        compiler_params=pltpu.CompilerParams(
            dimension_semantics=("parallel",),        # rows independent -> megacore
            vmem_limit_bytes=limit,
        ),
        cost_estimate=cost,
    )(x_p, w_p, b_p)

    return y[:n, :out_dim]


# ---------------------------------------------------------------------------
# 2) CCA-SSG loss head: single streaming H^T H Gram + tiny DxD finish
# ---------------------------------------------------------------------------
def _cca_gram_kernel(h_ref, g_ref):
    # Per-core accumulator slab; inner grid axis streams row tiles.
    @pl.when(pl.program_id(1) == 0)
    def _():
        g_ref[...] = jnp.zeros_like(g_ref)

    h = h_ref[...]
    # One Gram per tile: contraction over the row (node) dimension.
    g_ref[...] += lax.dot_general(
        h, h, (((0,), (0,)), ((), ())), preferred_element_type=jnp.float32)


def _cca_gram(h1, h2, *, stream_dtype=jnp.bfloat16, row_tile=None):
    """Streaming accumulation of G = [h1|h2|1]^T [h1|h2|1] (f32)."""
    n, d = h1.shape
    assert h2.shape == (n, d)
    s_bytes = jnp.dtype(stream_dtype).itemsize
    sub = _sublane_multiple(stream_dtype)

    # H = [h1 | h2 | ones], lane-padded to a 128 multiple.  The ones column
    # folds the column sums into the Gram (last valid row/col of G).
    d_tot = _round_up(2 * d + 1, 128)
    ones = jnp.ones((n, 1), dtype=h1.dtype)
    h = jnp.concatenate([h1, h2, ones], axis=1)
    h = jnp.pad(h, ((0, 0), (0, d_tot - (2 * d + 1)))).astype(stream_dtype)

    budget, limit = _vmem_budget()
    if row_tile is None:
        fixed = 2 * d_tot * d_tot * 4          # double-buffered f32 output slab
        per_row = 2 * d_tot * s_bytes          # double-buffered H tile
        tm = _auto_row_tile(n, per_row, fixed, sub, budget)
    else:
        tm = _round_up(int(row_tile), sub)

    # Leading size-2 "parallel" axis: one accumulator slab per TensorCore
    # (v7x); pure loop overhead on single-core v5e/v6e.  Padded rows are zero
    # (including the ones column) and contribute nothing.
    n_pad = _round_up(n, 2 * tm)
    if n_pad != n:
        h = jnp.pad(h, ((0, n_pad - n), (0, 0)))
    steps = n_pad // tm
    per_core = steps // 2

    cost = pl.CostEstimate(
        flops=2 * n_pad * d_tot * d_tot,
        transcendentals=0,
        bytes_accessed=n_pad * d_tot * s_bytes + 2 * d_tot * d_tot * 4,
    )

    g = pl.pallas_call(
        _cca_gram_kernel,
        out_shape=jax.ShapeDtypeStruct((2 * d_tot, d_tot), jnp.float32),
        grid_spec=pltpu.PrefetchScalarGridSpec(
            num_scalar_prefetch=0,
            grid=(2, per_core),
            in_specs=[
                pl.BlockSpec((tm, d_tot),
                             lambda c, i: (c * per_core + i, 0)),
            ],
            out_specs=pl.BlockSpec((d_tot, d_tot), lambda c, i: (c, 0)),
        ),
        compiler_params=pltpu.CompilerParams(
            dimension_semantics=("parallel", "arbitrary"),
            vmem_limit_bytes=limit,
        ),
        cost_estimate=cost,
    )(h)

    # Sum the two per-core partial slabs (tiny, wrapper-side).
    return g[:d_tot] + g[d_tot:]


def cca_ssg_loss(h1, h2, lambd=1e-3, *, stream_dtype=jnp.bfloat16, row_tile=None):
    """model_cca_ssg.forward's loss given the two encoder outputs h1, h2."""
    n, d = h1.shape
    g = _cca_gram(h1, h2, stream_dtype=stream_dtype, row_tile=row_tile)

    g11 = g[:d, :d]
    g12 = g[:d, d:2 * d]
    g22 = g[d:2 * d, d:2 * d]
    s1 = g[2 * d, :d]          # colsum(h1) via the ones column
    s2 = g[2 * d, d:2 * d]     # colsum(h2)

    nf = jnp.float32(n)
    mu1 = s1 / nf
    mu2 = s2 / nf
    # torch .std(0) is the unbiased (N-1) estimator.  Clamp the one-pass
    # variance so cancellation can never feed rsqrt a negative value.
    eps = jnp.float32(1e-12)
    var1 = jnp.maximum((jnp.diagonal(g11) - nf * mu1 * mu1) / (nf - 1.0), eps)
    var2 = jnp.maximum((jnp.diagonal(g22) - nf * mu2 * mu2) / (nf - 1.0), eps)
    inv1 = lax.rsqrt(var1)
    inv2 = lax.rsqrt(var2)

    def corr(gram, mu_a, mu_b, inv_a, inv_b):
        centered = gram - nf * (mu_a[:, None] * mu_b[None, :])
        return centered * (inv_a[:, None] * inv_b[None, :]) / nf

    c = corr(g12, mu1, mu2, inv1, inv2)
    c1 = corr(g11, mu1, mu1, inv1, inv1)
    c2 = corr(g22, mu2, mu2, inv2, inv2)

    iden = jnp.eye(d, dtype=jnp.float32)
    loss_inv = -jnp.trace(c)
    loss_dec1 = jnp.sum((iden - c1) ** 2)
    loss_dec2 = jnp.sum((iden - c2) ** 2)
    return loss_inv + lambd * (loss_dec1 + loss_dec2)


def _cca_loss_ref(h1, h2, lambd):
    """Plain-JAX reference replicating the PyTorch forward exactly."""
    n, d = h1.shape
    z1 = (h1 - h1.mean(0)) / jnp.std(h1, axis=0, ddof=1)
    z2 = (h2 - h2.mean(0)) / jnp.std(h2, axis=0, ddof=1)
    c = (z1.T @ z2) / n
    c1 = (z1.T @ z1) / n
    c2 = (z2.T @ z2) / n
    iden = jnp.eye(d, dtype=jnp.float32)
    return -jnp.trace(c) + lambd * (jnp.sum((iden - c1) ** 2)
                                    + jnp.sum((iden - c2) ** 2))


if __name__ == "__main__":
    key = jax.random.PRNGKey(0)
    k1, k2, k3, k4, k5 = jax.random.split(key, 5)

    # --- dense feature transform / probe head (nn.Linear semantics) ---
    N, HID, OUT = 200, 32, 16
    bound = 1.0 / math.sqrt(HID)
    x = jax.random.normal(k1, (N, HID), dtype=jnp.float32)
    weight = jax.random.uniform(k2, (OUT, HID), minval=-bound, maxval=bound,
                                dtype=jnp.float32)
    bias = jax.random.uniform(k3, (OUT,), minval=-bound, maxval=bound,
                              dtype=jnp.float32)

    y_ref = x @ weight.T + bias

    # Exact-semantics path (f32 streaming).
    y_f32 = jax.block_until_ready(
        linear_forward(x, weight, bias, stream_dtype=jnp.float32))
    assert y_f32.shape == (N, OUT)
    assert jnp.allclose(y_f32, y_ref, atol=1e-4, rtol=1e-4)

    # Default fast path (bf16 streaming, f32 accumulation) vs quantized ref.
    xq = x.astype(jnp.bfloat16).astype(jnp.float32)
    wq = weight.astype(jnp.bfloat16).astype(jnp.float32)
    y_bf16_ref = xq @ wq.T + bias
    y_bf16 = jax.block_until_ready(linear_forward(x, weight, bias))
    assert jnp.allclose(y_bf16, y_bf16_ref, atol=1e-3, rtol=1e-3)

    # Multi-tile path: force a small row tile that does not divide N.
    y_tiled = jax.block_until_ready(
        linear_forward(x, weight, bias, stream_dtype=jnp.float32, row_tile=64))
    assert jnp.allclose(y_tiled, y_ref, atol=1e-4, rtol=1e-4)

    # --- CCA-SSG loss on (stand-in) encoder outputs ---
    D, LAMBD = 32, 1e-3
    h1 = jax.random.normal(k4, (N, D), dtype=jnp.float32)
    h2 = jax.random.normal(k5, (N, D), dtype=jnp.float32)

    loss_ref = _cca_loss_ref(h1, h2, LAMBD)

    # Exact-semantics path (f32 streaming).
    loss_f32 = jax.block_until_ready(
        cca_ssg_loss(h1, h2, LAMBD, stream_dtype=jnp.float32))
    assert jnp.allclose(loss_f32, loss_ref, atol=1e-3, rtol=1e-3)

    # Default fast path (bf16 streaming) vs the same quantization applied to
    # the reference (MXU accumulation stays f32, so this is tight).
    h1q = h1.astype(jnp.bfloat16).astype(jnp.float32)
    h2q = h2.astype(jnp.bfloat16).astype(jnp.float32)
    loss_bf16_ref = _cca_loss_ref(h1q, h2q, LAMBD)
    loss_bf16 = jax.block_until_ready(cca_ssg_loss(h1, h2, LAMBD))
    assert jnp.allclose(loss_bf16, loss_bf16_ref, atol=2e-3, rtol=2e-3)

    # Multi-tile accumulation path (grid of (2, k), zero-padded tail rows).
    loss_tiled = jax.block_until_ready(
        cca_ssg_loss(h1, h2, LAMBD, stream_dtype=jnp.float32, row_tile=64))
    assert jnp.allclose(loss_tiled, loss_ref, atol=1e-3, rtol=1e-3)

    print("KERNEL_OK")
</pallas_src>

<mosaic_0001>
module attributes {stable_mosaic.version = 11 : i64} {
  func.func @_linear_kernel(%arg0: i32, %arg1: memref<200x32xf32, #tpu.memory_space<vmem>>, %arg2: memref<32x128xf32, #tpu.memory_space<vmem>>, %arg3: memref<1x128xf32, #tpu.memory_space<vmem>>, %arg4: memref<200x128xf32, #tpu.memory_space<vmem>>) attributes {dimension_semantics = [#tpu.dimension_semantics<parallel>], iteration_bounds = array<i64: 1>, scalar_prefetch = 0 : i64, scratch_operands = 0 : i64, tpu.core_type = #tpu.core_type<tc>, window_params = [{transform_indices = @transform_0, window_bounds = array<i64: 200, 32>}, {pipeline_mode = #tpu.pipeline_mode<synchronous>, transform_indices = @transform_1, window_bounds = array<i64: 32, 128>}, {pipeline_mode = #tpu.pipeline_mode<synchronous>, transform_indices = @transform_2, window_bounds = array<i64: 1, 128>}, {transform_indices = @transform_3, window_bounds = array<i64: 200, 128>}]} {
    %c0 = arith.constant 0 : index
    %c0_0 = arith.constant 0 : index
    %0 = vector.load %arg1[%c0, %c0_0] : memref<200x32xf32, #tpu.memory_space<vmem>>, vector<200x32xf32>
    %c0_1 = arith.constant 0 : index
    %c0_2 = arith.constant 0 : index
    %1 = vector.load %arg2[%c0_1, %c0_2] : memref<32x128xf32, #tpu.memory_space<vmem>>, vector<32x128xf32>
    %cst = arith.constant dense<0.000000e+00> : vector<200x128xf32>
    %2 = tpu.matmul %0, %1, %cst {dimension_numbers = #tpu.dot_dimension_numbers<[1], [0], [0], [1], [0, 0, 1, 1], [], []>, precision = #tpu.contract_precision<fp32>} : vector<200x32xf32>, vector<32x128xf32>, vector<200x128xf32> -> vector<200x128xf32>
    %c0_3 = arith.constant 0 : index
    %c0_4 = arith.constant 0 : index
    %3 = vector.load %arg3[%c0_3, %c0_4] : memref<1x128xf32, #tpu.memory_space<vmem>>, vector<1x128xf32>
    %4 = vector.broadcast %3 : vector<1x128xf32> to vector<200x128xf32>
    %5 = arith.addf %2, %4 : vector<200x128xf32>
    %c0_5 = arith.constant 0 : index
    %c0_6 = arith.constant 0 : index
    %6 = vector.load %arg4[%c0_5, %c0_6] : memref<200x128xf32, #tpu.memory_space<vmem>>, vector<200x128xf32>
    tpu.vector_store %arg4[%c0_5, %c0_6], %5 {strides = array<i32>} : memref<200x128xf32, #tpu.memory_space<vmem>>, vector<200x128xf32>,
    return
  }
  func.func @transform_0(%arg0: i32) -> (i32, i32) {
    %c0_i32 = arith.constant 0 : i32
    %c0_i32_0 = arith.constant 0 : i32
    return %arg0, %c0_i32 : i32, i32
  }
  func.func @transform_1(%arg0: i32) -> (i32, i32) {
    %c0_i32 = arith.constant 0 : i32
    %c0_i32_0 = arith.constant 0 : i32
    %c0_i32_1 = arith.constant 0 : i32
    return %c0_i32, %c0_i32_0 : i32, i32
  }
  func.func @transform_2(%arg0: i32) -> (i32, i32) {
    %c0_i32 = arith.constant 0 : i32
    %c0_i32_0 = arith.constant 0 : i32
    %c0_i32_1 = arith.constant 0 : i32
    return %c0_i32, %c0_i32_0 : i32, i32
  }
  func.func @transform_3(%arg0: i32) -> (i32, i32) {
    %c0_i32 = arith.constant 0 : i32
    %c0_i32_0 = arith.constant 0 : i32
    return %arg0, %c0_i32 : i32, i32
  }
}

</mosaic_0001>

<bundles_post_ra>
// kernel: tpu_custom_call.1
= control target key start
LH: loop header
LB: loop body
LE: loop exit
PB: predicated region body
PF: predicated region fallthrough
CT: control target
= control target key end

     0   :  { %vm48_vm0 = vcmask 261120   ;;  %s1833_s0 = inlined_call_operand.vmem [shape: f32[200,32], index: 0, kind: input, shape index: {}]   ;;  %s1834_s1 = inlined_call_operand.vmem [shape: f32[32,128], index: 1, kind: input, shape index: {}]   ;;  %s1835_s2 = inlined_call_operand.vmem [shape: f32[1,128], index: 2, kind: input, shape index: {}]   ;;  %s1836_s3 = inlined_call_operand.hbm [shape: f32[200,128], index: 3, kind: output, shape index: {}]  }
   0x1   :  { %v43_v0 = vld [vmem:[%s1834_s1 + $0x18] sm:$0xff]  ;;  %v42_v1 = vld [vmem:[%s1834_s1 + $0x10] sm:$0xff]  ;;  %v41_v2 = vld [vmem:[%s1834_s1 + $0x8] sm:$0xff] }
   0x2   :  { %v1166_v3 = vand.u32 4294901760, %v43_v0  ;;  %v1168_v4 = vand.u32 4294901760, %v42_v1  ;;  %v1170_v5 = vand.u32 4294901760, %v41_v2  ;;  %v40_v6 = vld [vmem:[%s1834_s1] sm:$0xff]  ;;  %v28_v7 = vld [vmem:[%s1833_s0 + $0x68] sm:$0xff]  ;;  %v29_v12 = vld [vmem:[%s1833_s0 + $0x70] sm:$0xff] }
   0x3   :  { %v15_v8 = vld [vmem:[%s1833_s0] sm:$0xff]  ;;  %v1181_v9 = vand.u32 4294901760, %v40_v6  ;;  %v89_v10 = vsel %vm48_vm0, %v28_v7, 0  ;;  %v16_v13 = vld [vmem:[%s1833_s0 + $0x8] sm:$0xff]  ;;  %v92_v20 = vsel %vm48_vm0, %v29_v12, 0 }
   0x4   :  { %v50_v11 = vsel %vm48_vm0, %v15_v8, 0  ;;  %1096 = vmatpush.msra.mxu2 %v1166_v3  ;;  %137 = vmatpush.msra.mxu0 %v1166_v3  ;;  %v358_v14 = vsub.f32 %v43_v0, %v1166_v3  ;;  %v1194_v15 = vand.u32 4294901760, %v89_v10  ;;  %v364_v16 = vsub.f32 %v42_v1, %v1168_v4 }
   0x5   :  { %v1198_v17 = vsub.f32 %v41_v2, %v1170_v5  ;;  %v1201_v18 = vsub.f32 %v40_v6, %v1181_v9  ;;  %v1203_v19 = vand.u32 4294901760, %v50_v11  ;;  %v53_v21 = vsel %vm48_vm0, %v16_v13, 0 }
   0x6   :  { %1097 = vmatpush.msra.mxu2 %v1168_v4  ;;  %v359_v22 = vand.u32 4294901760, %v358_v14  ;;  %v1209_v23 = vsub.f32 %v89_v10, %v1194_v15  ;;  %139 = vmatpush.msra.mxu0 %v1168_v4  ;;  %v365_v24 = vand.u32 4294901760, %v364_v16 }
   0x7   :  { %v371_v25 = vand.u32 4294901760, %v1198_v17 }
   0x8   :  { %8 = vsyncpa [#allocation3], 0  ;;  %v377_v26 = vand.u32 4294901760, %v1201_v18  ;;  %v1215_v27 = vsub.f32 %v50_v11, %v1203_v19  ;;  %v1217_v28 = vand.u32 4294901760, %v92_v20  ;;  %v1219_v29 = vand.u32 4294901760, %v53_v21  ;;  %1098 = vmatpush.msra.mxu2 %v1170_v5  ;;  %141 = vmatpush.msra.mxu0 %v1170_v5  ;;  %v30_v37 = vld [vmem:[%s1833_s0 + $0x78] sm:$0xff] }
   0x9   :  { %v360_v30 = vsub.f32 %v358_v14, %v359_v22  ;;  %v1845_v31 = vand.u32 4294901760, %v1209_v23  ;;  %v366_v32 = vsub.f32 %v364_v16, %v365_v24  ;;  %v372_v33 = vsub.f32 %v1198_v17, %v371_v25  ;;  %v17_v38 = vld [vmem:[%s1833_s0 + $0x10] sm:$0xff]  ;;  %v31_v50 = vld [vmem:[%s1833_s0 + $0x80] sm:$0xff]  ;;  %v18_v53 = vld [vmem:[%s1833_s0 + $0x18] sm:$0xff]  ;;  %s1084_s18 = sshll.u32 %s1836_s3, 4  ;;  %s1135_s19 = smov 128   ;;  %s1085_s18 = int_to_ptr.hbm [resolvable:$true] %s1084_s18 }
   0xa   :  { %v146_v34 = vand.u32 4294901760, %v1215_v27  ;;  %v1227_v35 = vsub.f32 %v92_v20, %v1217_v28  ;;  %v1230_v36 = vsub.f32 %v53_v21, %v1219_v29  ;;  %1099 = vmatpush.msra.mxu2 %v1181_v9  ;;  %143 = vmatpush.msra.mxu0 %v1181_v9  ;;  %v378_v42 = vsub.f32 %v1201_v18, %v377_v26  ;;  %v32_v7 = vld [vmem:[%s1833_s0 + $0x88] sm:$0xff]  ;;  %v19_v8 = vld [vmem:[%s1833_s0 + $0x20] sm:$0xff]  ;;  %s1136_s20 = smov 8  }
   0xb   :  { %v361_v39 = vand.u32 4294901760, %v360_v30  ;;  %v251_v40 = vsub.f32 %v1209_v23, %v1845_v31  ;;  %v367_v41 = vand.u32 4294901760, %v366_v32  ;;  %v373_v47 = vand.u32 4294901760, %v372_v33 }
   0xc   :  { %496 = vmatpush.msrb.mxu2 %v358_v14  ;;  %v147_v43 = vsub.f32 %v1215_v27, %v146_v34  ;;  %818 = vmatpush.msrb.mxu0 %v359_v22  ;;  %v1844_v44 = vand.u32 4294901760, %v1227_v35  ;;  %v154_v45 = vand.u32 4294901760, %v1230_v36  ;;  %v95_v48 = vsel %vm48_vm0, %v30_v37, 0 }
   0xd   :  { %1100 = vmatpush.msra.mxu3 %v361_v39  ;;  %v252_v46 = vand.u32 4294901760, %v251_v40  ;;  %362 = vmatpush.msra.mxu1 %v361_v39  ;;  %v56_v49 = vsel %vm48_vm0, %v17_v38, 0  ;;  %v1256_v52 = vand.u32 4294901760, %v95_v48  ;;  %v379_v54 = vand.u32 4294901760, %v378_v42  ;;  %v34_v42 = vld [vmem:[%s1833_s0 + $0x98] sm:$0xff] }
   0xe   :  { %v148_v51 = vand.u32 4294901760, %v147_v43  ;;  %499 = vmatpush.msrb.mxu2 %v364_v16  ;;  %822 = vmatpush.msrb.mxu0 %v365_v24  ;;  %v259_v55 = vsub.f32 %v1227_v35, %v1844_v44  ;;  %v1264_v56 = vand.u32 4294901760, %v56_v49  ;;  %v155_v57 = vsub.f32 %v1230_v36, %v154_v45  ;;  %v21_v43 = vld [vmem:[%s1833_s0 + $0x30] sm:$0xff] }
   0xf   :  { %253 = vmatmul.f32.vlgmr.msra.gmra.mxu2 %v252_v46  ;;  %1101 = vmatpush.msra.mxu3 %v367_v41  ;;  %v1270_v58 = vsub.f32 %v95_v48, %v1256_v52  ;;  %v98_v59 = vsel %vm48_vm0, %v31_v50, 0  ;;  %v59_v61 = vsel %vm48_vm0, %v18_v53, 0  ;;  %v101_v13 = vsel %vm48_vm0, %v32_v7, 0 }
  0x10   :  { %368 = vmatpush.msra.mxu1 %v367_v41  ;;  %149 = vmatmul.f32.vlgmr.msra.gmra.mxu0 %v148_v51  ;;  %v1274_v60 = vsub.f32 %v56_v49, %v1264_v56  ;;  %v260_v62 = vand.u32 4294901760, %v259_v55  ;;  %v1279_v0 = vand.u32 4294901760, %v98_v59  ;;  %v156_v1 = vand.u32 4294901760, %v155_v57 }
  0x11   :  { %1102 = vmatpush.msra.mxu3 %v373_v47  ;;  %502 = vmatpush.msrb.mxu2 %v1198_v17  ;;  %v1842_v63 = vand.u32 4294901760, %v1270_v58  ;;  %v1284_v6 = vand.u32 4294901760, %v59_v61  ;;  %v62_v14 = vsel %vm48_vm0, %v19_v8, 0  ;;  %v107_v50 = vsel %vm48_vm0, %v34_v42, 0 }
  0x12   :  { %374 = vmatpush.msra.mxu1 %v373_v47  ;;  %826 = vmatpush.msrb.mxu0 %v371_v25  ;;  %v162_v2 = vand.u32 4294901760, %v1274_v60  ;;  %v1301_v11 = vsub.f32 %v98_v59, %v1279_v0  ;;  %v1321_v22 = vand.u32 4294901760, %v62_v14  ;;  %v68_v51 = vsel %vm48_vm0, %v21_v43, 0 }
  0x13   :  { %1103 = vmatpush.msra.mxu3 %v379_v54  ;;  %505 = vmatpush.msrb.mxu2 %v1201_v18  ;;  %v267_v10 = vsub.f32 %v1270_v58, %v1842_v63  ;;  %v1308_v12 = vsub.f32 %v59_v61, %v1284_v6  ;;  %v1316_v18 = vand.u32 4294901760, %v101_v13  ;;  %v1374_v55 = vand.u32 4294901760, %v107_v50 }
  0x14   :  { %434 = vmatmul.f32.vlgmr.msra.gmra.mxu3 %v1194_v15  ;;  %380 = vmatpush.msra.mxu1 %v379_v54  ;;  %v1841_v17 = vand.u32 4294901760, %v1301_v11  ;;  %v1378_v61 = vand.u32 4294901760, %v68_v51 }
  0x15   :  { %645 = vmatpush.msrb.mxu3 %v1166_v3  ;;  %382 = vmatmul.f32.vlgmr.msra.gmra.mxu1 %v1203_v19  ;;  %v268_v16 = vand.u32 4294901760, %v267_v10  ;;  %v170_v21 = vand.u32 4294901760, %v1308_v12  ;;  %v1335_v25 = vsub.f32 %v101_v13, %v1316_v18  ;;  %v1391_v8 = vsub.f32 %v107_v50, %v1374_v55 }
  0x16   :  { %945 = vmatpush.msrb.mxu1 %v1166_v3  ;;  %830 = vmatpush.msrb.mxu0 %v377_v26  ;;  %v163_v3 = vsub.f32 %v1274_v60, %v162_v2  ;;  %v275_v24 = vsub.f32 %v1301_v11, %v1841_v17  ;;  %v1341_v26 = vsub.f32 %v62_v14, %v1321_v22 }
  0x17   :  { %261 = vmatmul.f32.gmra.mxu2 %v260_v62  ;;  %647 = vmatpush.msrb.mxu3 %v1168_v4  ;;  %v1840_v37 = vand.u32 4294901760, %v1335_v25  ;;  %v35_v62 = vld [vmem:[%s1833_s0 + $0xa0] sm:$0xff] }
  0x18   :  { %157 = vmatmul.f32.gmra.mxu0 %v156_v1  ;;  %947 = vmatpush.msrb.mxu1 %v1168_v4  ;;  %v164_v20 = vand.u32 4294901760, %v163_v3  ;;  %v33_v4 = vld [vmem:[%s1833_s0 + $0x90] sm:$0xff]  ;;  %v276_v33 = vand.u32 4294901760, %v275_v24  ;;  %v1852_v40 = vand.u32 4294901760, %v1341_v26  ;;  %v22_v1 = vld [vmem:[%s1833_s0 + $0x38] sm:$0xff]  ;;  %v1397_v3 = vsub.f32 %v68_v51, %v1378_v61 }
  0x19   :  { %649 = vmatpush.msrb.mxu3 %v1170_v5  ;;  %v104_v30 = vsel %vm48_vm0, %v33_v4, 0  ;;  %v283_v46 = vsub.f32 %v1335_v25, %v1840_v37  ;;  %v110_v13 = vsel %vm48_vm0, %v35_v62, 0  ;;  %v71_v14 = vsel %vm48_vm0, %v22_v1, 0 }
  0x1a   :  { %949 = vmatpush.msrb.mxu1 %v1170_v5  ;;  %v20_v5 = vld [vmem:[%s1833_s0 + $0x28] sm:$0xff]  ;;  %v1346_v38 = vand.u32 4294901760, %v104_v30  ;;  %v179_v48 = vsub.f32 %v1341_v26, %v1852_v40  ;;  %v1402_v4 = vand.u32 4294901760, %v110_v13  ;;  %v1848_v24 = vand.u32 4294901760, %v1397_v3 }
  0x1b   :  { %651 = vmatpush.msrb.mxu3 %v1181_v9  ;;  %v65_v32 = vsel %vm48_vm0, %v20_v5, 0  ;;  %v284_v53 = vand.u32 4294901760, %v283_v46 }
  0x1c   :  { %438 = vmatmul.f32.gmra.mxu3 %v1217_v28  ;;  %951 = vmatpush.msrb.mxu1 %v1181_v9  ;;  %v171_v9 = vsub.f32 %v1308_v12, %v170_v21  ;;  %v1350_v41 = vand.u32 4294901760, %v65_v32  ;;  %v1363_v47 = vsub.f32 %v104_v30, %v1346_v38  ;;  %v180_v57 = vand.u32 4294901760, %v179_v48  ;;  %v36_v30 = vld [vmem:[%s1833_s0 + $0xa8] sm:$0xff] }
  0x1d   :  { %386 = vmatmul.f32.gmra.mxu1 %v1219_v29  ;;  %v195_v42 = vsub.f32 %v1397_v3, %v1848_v24  ;;  %v113_v46 = vsel %vm48_vm0, %v36_v30, 0 }
  0x1e   :  { %v172_v39 = vand.u32 4294901760, %v171_v9  ;;  %v1369_v49 = vsub.f32 %v65_v32, %v1350_v41  ;;  %v1839_v54 = vand.u32 4294901760, %v1363_v47  ;;  %v1406_v9 = vand.u32 4294901760, %v71_v14  ;;  %v23_v32 = vld [vmem:[%s1833_s0 + $0x40] sm:$0xff] }
  0x1f   :  { %269 = vmatmul.f32.gmra.mxu2 %v268_v16  ;;  %v74_v48 = vsel %vm48_vm0, %v23_v32, 0 }
  0x20   :  { %165 = vmatmul.f32.gmra.mxu0 %v164_v20  ;;  %v1851_v59 = vand.u32 4294901760, %v1369_v49  ;;  %v291_v7 = vsub.f32 %v1363_v47, %v1839_v54  ;;  %v1838_v20 = vand.u32 4294901760, %v1391_v8  ;;  %v1425_v43 = vsub.f32 %v71_v14, %v1406_v9 }
  0x21   :  { %v1434_v1 = vand.u32 4294901760, %v74_v48 }
  0x22   :  { %v187_v10 = vsub.f32 %v1369_v49, %v1851_v59  ;;  %v292_v16 = vand.u32 4294901760, %v291_v7  ;;  %v1847_v62 = vand.u32 4294901760, %v1425_v43  ;;  %v37_v7 = vld [vmem:[%s1833_s0 + $0xb0] sm:$0xff] }
  0x23   :  { %v116_v30 = vsel %vm48_vm0, %v37_v7, 0  ;;  %v25_v7 = vld [vmem:[%s1833_s0 + $0x50] sm:$0xff] }
  0x24   :  { %442 = vmatmul.f32.gmra.mxu3 %v1256_v52  ;;  %v188_v5 = vand.u32 4294901760, %v187_v10  ;;  %v24_v10 = vld [vmem:[%s1833_s0 + $0x48] sm:$0xff]  ;;  %v80_v37 = vsel %vm48_vm0, %v25_v7, 0 }
  0x25   :  { %390 = vmatmul.f32.gmra.mxu1 %v1264_v56  ;;  %v77_v32 = vsel %vm48_vm0, %v24_v10, 0 }
  0x27   :  { %277 = vmatmul.f32.gmra.mxu2 %v276_v33  ;;  %v299_v33 = vsub.f32 %v1391_v8, %v1838_v20 }
  0x28   :  { %173 = vmatmul.f32.gmra.mxu0 %v172_v39  ;;  %v1419_v39 = vsub.f32 %v110_v13, %v1402_v4 }
  0x29   :  { %v300_v50 = vand.u32 4294901760, %v299_v33 }
  0x2a   :  { %v1837_v51 = vand.u32 4294901760, %v1419_v39 }
  0x2c   :  { %446 = vmatmul.f32.gmra.mxu3 %v1279_v0  ;;  %v307_v13 = vsub.f32 %v1419_v39, %v1837_v51  ;;  %v1462_v51 = vand.u32 4294901760, %v77_v32 }
  0x2d   :  { %394 = vmatmul.f32.gmra.mxu1 %v1284_v6 }
  0x2e   :  { %v308_v33 = vand.u32 4294901760, %v307_v13  ;;  %v1481_v20 = vsub.f32 %v77_v32, %v1462_v51  ;;  %v39_v32 = vld [vmem:[%s1833_s0 + $0xc0] sm:$0xff] }
  0x2f   :  { %285 = vmatmul.f32.gmra.mxu2 %v284_v53  ;;  %v1430_v53 = vand.u32 4294901760, %v113_v46  ;;  %v122_v31 = vsel %vm48_vm0, %v39_v32, 0 }
  0x30   :  { %181 = vmatmul.f32.gmra.mxu0 %v180_v57  ;;  %v196_v57 = vand.u32 4294901760, %v195_v42  ;;  %v1514_v24 = vand.u32 4294901760, %v122_v31 }
  0x31   :  { %v1447_v14 = vsub.f32 %v113_v46, %v1430_v53 }
  0x33   :  { %v1843_v42 = vand.u32 4294901760, %v1447_v14 }
  0x34   :  { %450 = vmatmul.f32.gmra.mxu3 %v1316_v18 }
  0x35   :  { %398 = vmatmul.f32.gmra.mxu1 %v1321_v22  ;;  %v315_v10 = vsub.f32 %v1447_v14, %v1843_v42  ;;  %v1490_v42 = vand.u32 4294901760, %v80_v37 }
  0x37   :  { %293 = vmatmul.f32.gmra.mxu2 %v292_v16  ;;  %v203_v16 = vsub.f32 %v1425_v43, %v1847_v62  ;;  %v1509_v44 = vsub.f32 %v80_v37, %v1490_v42  ;;  %v27_v37 = vld [vmem:[%s1833_s0 + $0x60] sm:$0xff] }
  0x38   :  { %189 = vmatmul.f32.gmra.mxu0 %v188_v5  ;;  %v1453_v5 = vsub.f32 %v74_v48, %v1434_v1  ;;  %v38_v48 = vld [vmem:[%s1833_s0 + $0xb8] sm:$0xff] }
  0x39   :  { %v204_v46 = vand.u32 4294901760, %v203_v16  ;;  %v119_v54 = vsel %vm48_vm0, %v38_v48, 0  ;;  %v26_v48 = vld [vmem:[%s1833_s0 + $0x58] sm:$0xff] }
  0x3a   :  { %v1486_v63 = vand.u32 4294901760, %v119_v54 }
  0x3c   :  { %454 = vmatmul.f32.gmra.mxu3 %v1346_v38 }
  0x3d   :  { %402 = vmatmul.f32.gmra.mxu1 %v1350_v41 }
  0x3f   :  { %301 = vmatmul.f32.gmra.mxu2 %v300_v50  ;;  %v1458_v50 = vand.u32 4294901760, %v116_v30 }
  0x40   :  { %197 = vmatmul.f32.gmra.mxu0 %v196_v57  ;;  %v1846_v57 = vand.u32 4294901760, %v1453_v5 }
  0x41   :  { %v1475_v13 = vsub.f32 %v116_v30, %v1458_v50 }
  0x42   :  { %v211_v16 = vsub.f32 %v1453_v5, %v1846_v57  ;;  %v83_v57 = vsel %vm48_vm0, %v26_v48, 0  ;;  %v1528_v48 = vsub.f32 %v122_v31, %v1514_v24 }
  0x43   :  { %v1849_v17 = vand.u32 4294901760, %v1475_v13 }
  0x44   :  { %458 = vmatmul.f32.gmra.mxu3 %v1374_v55  ;;  %v212_v30 = vand.u32 4294901760, %v211_v16 }
  0x45   :  { %406 = vmatmul.f32.gmra.mxu1 %v1378_v61  ;;  %v323_v7 = vsub.f32 %v1475_v13, %v1849_v17  ;;  %v1518_v17 = vand.u32 4294901760, %v83_v57 }
  0x47   :  { %309 = vmatmul.f32.gmra.mxu2 %v308_v33  ;;  %v316_v33 = vand.u32 4294901760, %v315_v10  ;;  %v1503_v10 = vsub.f32 %v119_v54, %v1486_v63 }
  0x48   :  { %205 = vmatmul.f32.gmra.mxu0 %v204_v46  ;;  %v1850_v46 = vand.u32 4294901760, %v1481_v20 }
  0x49   :  { %v1853_v62 = vand.u32 4294901760, %v1503_v10 }
  0x4a   :  { %v219_v16 = vsub.f32 %v1481_v20, %v1850_v46  ;;  %v86_v46 = vsel %vm48_vm0, %v27_v37, 0 }
  0x4b   :  { %v331_v32 = vsub.f32 %v1503_v10, %v1853_v62  ;;  %v1540_v31 = vand.u32 4294901760, %v86_v46 }
  0x4c   :  { %462 = vmatmul.f32.gmra.mxu3 %v1402_v4  ;;  %v220_v54 = vand.u32 4294901760, %v219_v16  ;;  %v1534_v16 = vsub.f32 %v83_v57, %v1518_v17 }
  0x4d   :  { %410 = vmatmul.f32.gmra.mxu1 %v1406_v9  ;;  %v332_v59 = vand.u32 4294901760, %v331_v32  ;;  %v1550_v37 = vsub.f32 %v86_v46, %v1540_v31 }
  0x4e   :  { %v234_v62 = vand.u32 4294901760, %v1534_v16 }
  0x4f   :  { %317 = vmatmul.f32.gmra.mxu2 %v316_v33  ;;  %v324_v33 = vand.u32 4294901760, %v323_v7 }
  0x50   :  { %213 = vmatmul.f32.gmra.mxu0 %v212_v30  ;;  %v1854_v30 = vand.u32 4294901760, %v1509_v44 }
  0x52   :  { %v227_v7 = vsub.f32 %v1509_v44, %v1854_v30  ;;  %v242_v30 = vand.u32 4294901760, %v1550_v37 }
  0x54   :  { %466 = vmatmul.f32.gmra.mxu3 %v1430_v53  ;;  %v228_v40 = vand.u32 4294901760, %v227_v7 }
  0x55   :  { %414 = vmatmul.f32.gmra.mxu1 %v1434_v1 }
  0x57   :  { %325 = vmatmul.f32.gmra.mxu2 %v324_v33  ;;  %v1855_v33 = vand.u32 4294901760, %v1528_v48 }
  0x58   :  { %221 = vmatmul.f32.gmra.mxu0 %v220_v54  ;;  %v235_v54 = vsub.f32 %v1534_v16, %v234_v62 }
  0x59   :  { %v339_v57 = vsub.f32 %v1528_v48, %v1855_v33 }
  0x5a   :  { %v236_v7 = vand.u32 4294901760, %v235_v54 }
  0x5b   :  { %v340_v32 = vand.u32 4294901760, %v339_v57  ;;  %v1857_v57 = vand.u32 4294901760, %v1369_v49 }
  0x5c   :  { %470 = vmatmul.f32.gmra.mxu3 %v1458_v50 }
  0x5d   :  { %418 = vmatmul.f32.gmra.mxu1 %v1462_v51 }
  0x5f   :  { %333 = vmatmul.f32.gmra.mxu2 %v332_v59 }
  0x60   :  { %229 = vmatmul.f32.gmra.mxu0 %v228_v40  ;;  %v243_v40 = vsub.f32 %v1550_v37, %v242_v30 }
  0x62   :  { %v244_v59 = vand.u32 4294901760, %v243_v40 }
  0x64   :  { %474 = vmatmul.f32.gmra.mxu3 %v1486_v63 }
  0x65   :  { %422 = vmatmul.f32.gmra.mxu1 %v1490_v42 }
  0x67   :  { %341 = vmatmul.f32.gmra.mxu2 %v340_v32 }
  0x68   :  { %237 = vmatmul.f32.gmra.mxu0 %v236_v7 }
  0x6c   :  { %478 = vmatmul.f32.gmra.mxu3 %v1514_v24 }
  0x6d   :  { %426 = vmatmul.f32.gmra.mxu1 %v1518_v17 }
  0x6f   :  { %508 = vmatmul.f32.vlgmr.msrb.gmra.mxu2 %v1215_v27 }
  0x70   :  { %245 = vmatmul.f32.gmra.mxu0 %v244_v59  ;;  %v1858_v59 = vand.u32 4294901760, %v1397_v3 }
  0x74   :  { %655 = vmatmul.f32.vlgmr.msrb.gmra.mxu3 %v146_v34 }
  0x75   :  { %430 = vmatmul.f32.gmra.mxu1 %v1540_v31 }
  0x77   :  { %513 = vmatmul.f32.gmra.mxu2 %v1230_v36 }
  0x78   :  { %832 = vmatmul.f32.vlgmr.msrb.gmra.mxu0 %v1203_v19 }
  0x7c   :  { %661 = vmatmul.f32.gmra.mxu3 %v154_v45  ;;  %v1856_v45 = vand.u32 4294901760, %v1341_v26 }
  0x7d   :  { %953 = vmatmul.f32.vlgmr.msrb.gmra.mxu1 %v1203_v19  ;;  %v1586_v19 = vld [vmem:[%s1835_s2] ss:$0 sm:$0xff]  ;;  %s1134_s2 = smov [#allocation2]  }
  0x7e   :  { %s1082_s15 = sshll.u32 %s1134_s2, 4  ;;  %s1083_s15 = int_to_ptr.vmem [resolvable:$true] %s1082_s15 }
  0x7f   :  { %518 = vmatmul.f32.gmra.mxu2 %v1274_v60 }
  0x80   :  { %836 = vmatmul.f32.gmra.mxu0 %v1219_v29 }
  0x84   :  { %667 = vmatmul.f32.gmra.mxu3 %v162_v2 }
  0x85   :  { %957 = vmatmul.f32.gmra.mxu1 %v1219_v29 }
  0x87   :  { %523 = vmatmul.f32.gmra.mxu2 %v1308_v12 }
  0x88   :  { %840 = vmatmul.f32.gmra.mxu0 %v1264_v56 }
  0x8c   :  { %673 = vmatmul.f32.gmra.mxu3 %v170_v21 }
  0x8d   :  { %961 = vmatmul.f32.gmra.mxu1 %v1264_v56  ;;  %v1579_v27 = vpop.f32.mrf.mxu0 }
  0x8f   :  { %528 = vmatmul.f32.gmra.mxu2 %v1341_v26 }
  0x90   :  { %844 = vmatmul.f32.gmra.mxu0 %v1284_v6 }
  0x92   :  { %v254_v29 = vpop.f32.mrf.mxu2  ;;  %v1588_v34 = vpop.f32.mrf.mxu1 }
  0x93   :  { %v255_v36 = vadd.f32 %v1586_v19, %v254_v29 }
  0x94   :  { %679 = vmatmul.f32.gmra.mxu3 %v1856_v45 }
  0x95   :  { %965 = vmatmul.f32.gmra.mxu1 %v1284_v6  ;;  %v1594_v56 = vpop.f32.mrf.mxu0 }
  0x97   :  { %533 = vmatmul.f32.gmra.mxu2 %v1369_v49  ;;  %v435_v60 = vpop.f32.mrf.mxu3 }
  0x98   :  { %v1597_v2 = vadd.f32 %v435_v60, %v255_v36  ;;  %848 = vmatmul.f32.gmra.mxu0 %v1321_v22 }
  0x9a   :  { %v262_v12 = vpop.f32.mrf.mxu2  ;;  %v1600_v21 = vpop.f32.mrf.mxu1 }
  0x9b   :  { %v263_v46 = vadd.f32 %v1586_v19, %v262_v12  ;;  %v1859_v12 = vand.u32 4294901760, %v1425_v43 }
  0x9c   :  { %685 = vmatmul.f32.gmra.mxu3 %v1857_v57 }
  0x9d   :  { %969 = vmatmul.f32.gmra.mxu1 %v1321_v22  ;;  %v1606_v6 = vpop.f32.mrf.mxu0 }
  0x9f   :  { %538 = vmatmul.f32.gmra.mxu2 %v1397_v3  ;;  %v439_v26 = vpop.f32.mrf.mxu3 }
  0xa0   :  { %v1609_v54 = vadd.f32 %v439_v26, %v263_v46  ;;  %852 = vmatmul.f32.gmra.mxu0 %v1350_v41 }
  0xa2   :  { %v270_v32 = vpop.f32.mrf.mxu2  ;;  %v1612_v7 = vpop.f32.mrf.mxu1 }
  0xa3   :  { %v271_v40 = vadd.f32 %v1586_v19, %v270_v32 }
  0xa4   :  { %691 = vmatmul.f32.gmra.mxu3 %v1858_v59 }
  0xa5   :  { %973 = vmatmul.f32.gmra.mxu1 %v1350_v41  ;;  %v1618_v22 = vpop.f32.mrf.mxu0 }
  0xa7   :  { %543 = vmatmul.f32.gmra.mxu2 %v1425_v43  ;;  %v443_v49 = vpop.f32.mrf.mxu3 }
  0xa8   :  { %v1621_v29 = vadd.f32 %v443_v49, %v271_v40  ;;  %856 = vmatmul.f32.gmra.mxu0 %v1378_v61  ;;  %v1860_v40 = vand.u32 4294901760, %v1453_v5 }
  0xaa   :  { %v278_v36 = vpop.f32.mrf.mxu2  ;;  %v1624_v45 = vpop.f32.mrf.mxu1 }
  0xab   :  { %v279_v60 = vadd.f32 %v1586_v19, %v278_v36 }
  0xac   :  { %697 = vmatmul.f32.gmra.mxu3 %v1859_v12  ;;  %v1861_v12 = vand.u32 4294901760, %v1481_v20 }
  0xad   :  { %977 = vmatmul.f32.gmra.mxu1 %v1378_v61  ;;  %v1630_v41 = vpop.f32.mrf.mxu0 }
  0xaf   :  { %548 = vmatmul.f32.gmra.mxu2 %v1453_v5  ;;  %v447_v3 = vpop.f32.mrf.mxu3 }
  0xb0   :  { %v1633_v46 = vadd.f32 %v447_v3, %v279_v60  ;;  %860 = vmatmul.f32.gmra.mxu0 %v1406_v9 }
  0xb2   :  { %v286_v57 = vpop.f32.mrf.mxu2  ;;  %v1636_v26 = vpop.f32.mrf.mxu1 }
  0xb3   :  { %v287_v32 = vadd.f32 %v1586_v19, %v286_v57 }
  0xb4   :  { %703 = vmatmul.f32.gmra.mxu3 %v1860_v40 }
  0xb5   :  { %981 = vmatmul.f32.gmra.mxu1 %v1406_v9  ;;  %v1642_v61 = vpop.f32.mrf.mxu0 }
  0xb7   :  { %553 = vmatmul.f32.gmra.mxu2 %v1481_v20  ;;  %v451_v43 = vpop.f32.mrf.mxu3 }
  0xb8   :  { %v1645_v59 = vadd.f32 %v451_v43, %v287_v32  ;;  %864 = vmatmul.f32.gmra.mxu0 %v1434_v1  ;;  %v1862_v43 = vand.u32 4294901760, %v1509_v44 }
  0xba   :  { %v294_v49 = vpop.f32.mrf.mxu2  ;;  %v1648_v36 = vpop.f32.mrf.mxu1 }
  0xbb   :  { %v295_v60 = vadd.f32 %v1586_v19, %v294_v49 }
  0xbc   :  { %709 = vmatmul.f32.gmra.mxu3 %v1861_v12 }
  0xbd   :  { %985 = vmatmul.f32.gmra.mxu1 %v1434_v1  ;;  %v1654_v9 = vpop.f32.mrf.mxu0 }
  0xbf   :  { %558 = vmatmul.f32.gmra.mxu2 %v1509_v44  ;;  %v455_v5 = vpop.f32.mrf.mxu3 }
  0xc0   :  { %v1657_v3 = vadd.f32 %v455_v5, %v295_v60  ;;  %868 = vmatmul.f32.gmra.mxu0 %v1462_v51 }
  0xc2   :  { %v302_v57 = vpop.f32.mrf.mxu2  ;;  %v1660_v32 = vpop.f32.mrf.mxu1 }
  0xc3   :  { %v303_v40 = vadd.f32 %v1586_v19, %v302_v57 }
  0xc4   :  { %715 = vmatmul.f32.gmra.mxu3 %v1862_v43 }
  0xc5   :  { %989 = vmatmul.f32.gmra.mxu1 %v1462_v51  ;;  %v1666_v20 = vpop.f32.mrf.mxu0 }
  0xc7   :  { %563 = vmatmul.f32.gmra.mxu2 %v1534_v16  ;;  %v459_v1 = vpop.f32.mrf.mxu3 }
  0xc8   :  { %v1669_v49 = vadd.f32 %v459_v1, %v303_v40  ;;  %872 = vmatmul.f32.gmra.mxu0 %v1490_v42 }
  0xca   :  { %v310_v60 = vpop.f32.mrf.mxu2  ;;  %v1672_v12 = vpop.f32.mrf.mxu1 }
  0xcb   :  { %v311_v5 = vadd.f32 %v1586_v19, %v310_v60 }
  0xcc   :  { %721 = vmatmul.f32.gmra.mxu3 %v234_v62 }
  0xcd   :  { %993 = vmatmul.f32.gmra.mxu1 %v1490_v42  ;;  %v1678_v44 = vpop.f32.mrf.mxu0 }
  0xcf   :  { %568 = vmatmul.f32.gmra.mxu2 %v1550_v37  ;;  %v463_v51 = vpop.f32.mrf.mxu3 }
  0xd0   :  { %v1681_v57 = vadd.f32 %v463_v51, %v311_v5  ;;  %876 = vmatmul.f32.gmra.mxu0 %v1518_v17 }
  0xd2   :  { %1863 = vst [vmem:[#allocation5_spill] sm:$0xff] %v1681_v57  ;;  %v318_v40 = vpop.f32.mrf.mxu2  ;;  %v1684_v43 = vpop.f32.mrf.mxu1 }
  0xd3   :  { %v319_v1 = vadd.f32 %v1586_v19, %v318_v40  ;;  %v1865_v40 = vand.u32 4294901760, %v1209_v23 }
  0xd4   :  { %727 = vmatmul.f32.gmra.mxu3 %v242_v30 }
  0xd5   :  { %997 = vmatmul.f32.gmra.mxu1 %v1518_v17  ;;  %v1690_v62 = vpop.f32.mrf.mxu0 }
  0xd7   :  { %573 = vmatmul.f32.gmra.mxu2 %v1209_v23  ;;  %v467_v42 = vpop.f32.mrf.mxu3 }
  0xd8   :  { %v1693_v16 = vadd.f32 %v467_v42, %v319_v1  ;;  %880 = vmatmul.f32.gmra.mxu0 %v1540_v31 }
  0xda   :  { %1864 = vst [vmem:[#allocation6_spill] sm:$0xff] %v1693_v16  ;;  %v326_v60 = vpop.f32.mrf.mxu2  ;;  %v1696_v5 = vpop.f32.mrf.mxu1 }
  0xdb   :  { %v327_v51 = vadd.f32 %v1586_v19, %v326_v60  ;;  %v1867_v60 = vand.u32 4294901760, %v1227_v35 }
  0xdc   :  { %733 = vmatmul.f32.gmra.mxu3 %v1865_v40 }
  0xdd   :  { %1001 = vmatmul.f32.gmra.mxu1 %v1540_v31  ;;  %v1702_v17 = vpop.f32.mrf.mxu0 }
  0xdf   :  { %578 = vmatmul.f32.gmra.mxu2 %v1227_v35  ;;  %v471_v30 = vpop.f32.mrf.mxu3 }
  0xe0   :  { %v1705_v37 = vadd.f32 %v471_v30, %v327_v51  ;;  %884 = vmatmul.f32.gmra.mxu0 %v1194_v15 }
  0xe2   :  { %1866 = vst [vmem:[#allocation7_spill] sm:$0xff] %v1705_v37  ;;  %v334_v1 = vpop.f32.mrf.mxu2  ;;  %v1708_v42 = vpop.f32.mrf.mxu1 }
  0xe3   :  { %v335_v33 = vadd.f32 %v1586_v19, %v334_v1  ;;  %v1869_v1 = vand.u32 4294901760, %v1270_v58 }
  0xe4   :  { %739 = vmatmul.f32.gmra.mxu3 %v1867_v60 }
  0xe5   :  { %1005 = vmatmul.f32.gmra.mxu1 %v1194_v15  ;;  %v1714_v23 = vpop.f32.mrf.mxu0 }
  0xe7   :  { %583 = vmatmul.f32.gmra.mxu2 %v1270_v58  ;;  %v475_v31 = vpop.f32.mrf.mxu3 }
  0xe8   :  { %v1717_v40 = vadd.f32 %v475_v31, %v335_v33  ;;  %888 = vmatmul.f32.gmra.mxu0 %v1217_v28  ;;  %v151_v33 = vadd.f32 %v1586_v19, %v1579_v27  ;;  %v159_v27 = vadd.f32 %v1586_v19, %v1594_v56 }
  0xea   :  { %1868 = vst [vmem:[#allocation8_spill] sm:$0xff] %v1717_v40  ;;  %v342_v51 = vpop.f32.mrf.mxu2  ;;  %v1720_v30 = vpop.f32.mrf.mxu1  ;;  %v384_v58 = vadd.f32 %v1588_v34, %v151_v33  ;;  %v388_v34 = vadd.f32 %v1600_v21, %v159_v27  ;;  %v1872_v33 = vand.u32 4294901760, %v1335_v25  ;;  %v175_v27 = vadd.f32 %v1586_v19, %v1618_v22 }
  0xeb   :  { %v343_v37 = vadd.f32 %v1586_v19, %v342_v51  ;;  %v1871_v51 = vand.u32 4294901760, %v1301_v11 }
  0xec   :  { %745 = vmatmul.f32.gmra.mxu3 %v1869_v1 }
  0xed   :  { %1009 = vmatmul.f32.gmra.mxu1 %v1217_v28  ;;  %v1726_v15 = vpop.f32.mrf.mxu0 }
  0xef   :  { %588 = vmatmul.f32.gmra.mxu2 %v1301_v11  ;;  %v479_v35 = vpop.f32.mrf.mxu3 }
  0xf0   :  { %v1731_v60 = vadd.f32 %v479_v35, %v343_v37  ;;  %892 = vmatmul.f32.gmra.mxu0 %v1256_v52 }
  0xf2   :  { %1870 = vst [vmem:[#allocation9_spill] sm:$0xff] %v1731_v60  ;;  %v509_v31 = vpop.f32.mrf.mxu2  ;;  %v1734_v40 = vpop.f32.mrf.mxu1 }
  0xf3   :  { %v510_v1 = vadd.f32 %v509_v31, %v384_v58 }
  0xf4   :  { %751 = vmatmul.f32.gmra.mxu3 %v1871_v51 }
  0xf5   :  { %1013 = vmatmul.f32.gmra.mxu1 %v1256_v52  ;;  %v833_v28 = vpop.f32.mrf.mxu0 }
  0xf7   :  { %593 = vmatmul.f32.gmra.mxu2 %v1335_v25  ;;  %v656_v16 = vpop.f32.mrf.mxu3 }
  0xf8   :  { %v657_v37 = vadd.f32 %v656_v16, %v510_v1  ;;  %896 = vmatmul.f32.gmra.mxu0 %v1279_v0  ;;  %v167_v16 = vadd.f32 %v1586_v19, %v1606_v6 }
  0xfa   :  { %v514_v35 = vpop.f32.mrf.mxu2  ;;  %v834_v60 = vadd.f32 %v833_v28, %v657_v37  ;;  %v954_v57 = vpop.f32.mrf.mxu1  ;;  %v392_v25 = vadd.f32 %v1612_v7, %v167_v16 }
  0xfb   :  { %v515_v31 = vadd.f32 %v514_v35, %v388_v34 }
  0xfc   :  { %v955_v11 = vadd.f32 %v954_v57, %v834_v60  ;;  %757 = vmatmul.f32.gmra.mxu3 %v1872_v33 }
  0xfd   :  { %1017 = vmatmul.f32.gmra.mxu1 %v1279_v0  ;;  %v837_v52 = vpop.f32.mrf.mxu0  ;;  %v1873_v0 = vand.u32 4294901760, %v1363_v47 }
  0xfe   :  { %1053 = vst [vmem:[#allocation2] sm:$0xff] %v955_v11 }
  0xff   :  { %598 = vmatmul.f32.gmra.mxu2 %v1363_v47  ;;  %v662_v56 = vpop.f32.mrf.mxu3  ;;  %v396_v47 = vadd.f32 %v1624_v45, %v175_v27 }
 0x100   :  { %v663_v58 = vadd.f32 %v662_v56, %v515_v31  ;;  %900 = vmatmul.f32.gmra.mxu0 %v1316_v18  ;;  %v183_v31 = vadd.f32 %v1586_v19, %v1630_v41 }
 0x102   :  { %v519_v51 = vpop.f32.mrf.mxu2  ;;  %v838_v21 = vadd.f32 %v837_v52, %v663_v58  ;;  %v958_v57 = vpop.f32.mrf.mxu1 }
 0x103   :  { %v520_v1 = vadd.f32 %v519_v51, %v392_v25  ;;  %v191_v25 = vadd.f32 %v1586_v19, %v1642_v61 }
 0x104   :  { %v959_v60 = vadd.f32 %v958_v57, %v838_v21  ;;  %763 = vmatmul.f32.gmra.mxu3 %v1873_v0 }
 0x105   :  { %1021 = vmatmul.f32.gmra.mxu1 %v1316_v18  ;;  %v841_v28 = vpop.f32.mrf.mxu0  ;;  %v1874_v18 = vand.u32 4294901760, %v1391_v8 }
 0x106   :  { %1054 = vst [vmem:[#allocation2 + $0x8] sm:$0xff] %v959_v60 }
 0x107   :  { %603 = vmatmul.f32.gmra.mxu2 %v1391_v8  ;;  %v668_v6 = vpop.f32.mrf.mxu3  ;;  %v400_v8 = vadd.f32 %v1636_v26, %v183_v31 }
 0x108   :  { %v669_v37 = vadd.f32 %v668_v6, %v520_v1  ;;  %904 = vmatmul.f32.gmra.mxu0 %v1346_v38 }
 0x10a   :  { %v524_v35 = vpop.f32.mrf.mxu2  ;;  %v842_v7 = vadd.f32 %v841_v28, %v669_v37  ;;  %v962_v34 = vpop.f32.mrf.mxu1  ;;  %v199_v37 = vadd.f32 %v1586_v19, %v1654_v9 }
 0x10b   :  { %v525_v52 = vadd.f32 %v524_v35, %v396_v47 }
 0x10c   :  { %v963_v11 = vadd.f32 %v962_v34, %v842_v7  ;;  %769 = vmatmul.f32.gmra.mxu3 %v1874_v18 }
 0x10d   :  { %1025 = vmatmul.f32.gmra.mxu1 %v1346_v38  ;;  %v845_v33 = vpop.f32.mrf.mxu0  ;;  %v1875_v38 = vand.u32 4294901760, %v1419_v39 }
 0x10e   :  { %1055 = vst [vmem:[#allocation2 + $0x10] sm:$0xff] %v963_v11 }
 0x10f   :  { %608 = vmatmul.f32.gmra.mxu2 %v1419_v39  ;;  %v674_v22 = vpop.f32.mrf.mxu3  ;;  %v404_v39 = vadd.f32 %v1648_v36, %v191_v25 }
 0x110   :  { %v675_v56 = vadd.f32 %v674_v22, %v525_v52  ;;  %908 = vmatmul.f32.gmra.mxu0 %v1374_v55 }
 0x112   :  { %v529_v16 = vpop.f32.mrf.mxu2  ;;  %v846_v45 = vadd.f32 %v845_v33, %v675_v56  ;;  %v966_v58 = vpop.f32.mrf.mxu1  ;;  %v207_v33 = vadd.f32 %v1586_v19, %v1666_v20 }
 0x113   :  { %v530_v57 = vadd.f32 %v529_v16, %v400_v8 }
 0x114   :  { %v967_v51 = vadd.f32 %v966_v58, %v846_v45  ;;  %775 = vmatmul.f32.gmra.mxu3 %v1875_v38  ;;  %v215_v58 = vadd.f32 %v1586_v19, %v1678_v44  ;;  %v223_v44 = vadd.f32 %v1586_v19, %v1690_v62 }
 0x115   :  { %1029 = vmatmul.f32.gmra.mxu1 %v1374_v55  ;;  %v849_v21 = vpop.f32.mrf.mxu0  ;;  %v1876_v55 = vand.u32 4294901760, %v1447_v14 }
 0x116   :  { %1056 = vst [vmem:[#allocation2 + $0x18] sm:$0xff] %v967_v51 }
 0x117   :  { %613 = vmatmul.f32.gmra.mxu2 %v1447_v14  ;;  %v680_v41 = vpop.f32.mrf.mxu3  ;;  %v408_v14 = vadd.f32 %v1660_v32, %v199_v37 }
 0x118   :  { %v681_v60 = vadd.f32 %v680_v41, %v530_v57  ;;  %912 = vmatmul.f32.gmra.mxu0 %v1402_v4 }
 0x11a   :  { %v534_v0 = vpop.f32.mrf.mxu2  ;;  %v850_v26 = vadd.f32 %v849_v21, %v681_v60  ;;  %v970_v28 = vpop.f32.mrf.mxu1 }
 0x11b   :  { %v535_v27 = vadd.f32 %v534_v0, %v404_v39 }
 0x11c   :  { %v971_v1 = vadd.f32 %v970_v28, %v850_v26  ;;  %781 = vmatmul.f32.gmra.mxu3 %v1876_v55  ;;  %v231_v55 = vadd.f32 %v1586_v19, %v1702_v17 }
 0x11d   :  { %1033 = vmatmul.f32.gmra.mxu1 %v1402_v4  ;;  %v853_v6 = vpop.f32.mrf.mxu0  ;;  %v1877_v4 = vand.u32 4294901760, %v1475_v13 }
 0x11e   :  { %1057 = vst [vmem:[#allocation2 + $0x20] sm:$0xff] %v971_v1  ;;  %v424_v37 = vadd.f32 %v1708_v42, %v231_v55  ;;  %v247_v42 = vadd.f32 %v1586_v19, %v1726_v15 }
 0x11f   :  { %618 = vmatmul.f32.gmra.mxu2 %v1475_v13  ;;  %v686_v61 = vpop.f32.mrf.mxu3  ;;  %v412_v13 = vadd.f32 %v1672_v12, %v207_v33 }
 0x120   :  { %v687_v35 = vadd.f32 %v686_v61, %v535_v27  ;;  %916 = vmatmul.f32.gmra.mxu0 %v1430_v53 }
 0x122   :  { %v539_v7 = vpop.f32.mrf.mxu2  ;;  %v854_v36 = vadd.f32 %v853_v6, %v687_v35  ;;  %v974_v34 = vpop.f32.mrf.mxu1 }
 0x123   :  { %v540_v18 = vadd.f32 %v539_v7, %v408_v14 }
 0x124   :  { %v975_v47 = vadd.f32 %v974_v34, %v854_v36  ;;  %787 = vmatmul.f32.gmra.mxu3 %v1877_v4 }
 0x125   :  { %1037 = vmatmul.f32.gmra.mxu1 %v1430_v53  ;;  %v857_v11 = vpop.f32.mrf.mxu0  ;;  %v1878_v53 = vand.u32 4294901760, %v1503_v10 }
 0x126   :  { %1058 = vst [vmem:[#allocation2 + $0x28] sm:$0xff] %v975_v47 }
 0x127   :  { %623 = vmatmul.f32.gmra.mxu2 %v1503_v10  ;;  %v692_v9 = vpop.f32.mrf.mxu3  ;;  %v416_v10 = vadd.f32 %v1684_v43, %v215_v58  ;;  %v420_v43 = vadd.f32 %v1696_v5, %v223_v44 }
 0x128   :  { %v693_v52 = vadd.f32 %v692_v9, %v540_v18  ;;  %920 = vmatmul.f32.gmra.mxu0 %v1458_v50 }
 0x12a   :  { %v544_v22 = vpop.f32.mrf.mxu2  ;;  %v858_v32 = vadd.f32 %v857_v11, %v693_v52  ;;  %v978_v31 = vpop.f32.mrf.mxu1 }
 0x12b   :  { %v545_v45 = vadd.f32 %v544_v22, %v412_v13 }
 0x12c   :  { %v979_v56 = vadd.f32 %v978_v31, %v858_v32  ;;  %793 = vmatmul.f32.gmra.mxu3 %v1878_v53 }
 0x12d   :  { %1041 = vmatmul.f32.gmra.mxu1 %v1458_v50  ;;  %v861_v16 = vpop.f32.mrf.mxu0  ;;  %v1879_v50 = vand.u32 4294901760, %v1528_v48 }
 0x12e   :  { %1059 = vst [vmem:[#allocation2 + $0x30] sm:$0xff] %v979_v56 }
 0x12f   :  { %628 = vmatmul.f32.gmra.mxu2 %v1528_v48  ;;  %v698_v20 = vpop.f32.mrf.mxu3 }
 0x130   :  { %v699_v8 = vadd.f32 %v698_v20, %v545_v45  ;;  %924 = vmatmul.f32.gmra.mxu0 %v1486_v63 }
 0x132   :  { %v549_v51 = vpop.f32.mrf.mxu2  ;;  %v862_v12 = vadd.f32 %v861_v16, %v699_v8  ;;  %v982_v38 = vpop.f32.mrf.mxu1 }
 0x133   :  { %v550_v41 = vadd.f32 %v549_v51, %v416_v10 }
 0x134   :  { %v983_v21 = vadd.f32 %v982_v38, %v862_v12  ;;  %799 = vmatmul.f32.gmra.mxu3 %v1879_v50 }
 0x135   :  { %1045 = vmatmul.f32.gmra.mxu1 %v1486_v63  ;;  %v865_v57 = vpop.f32.mrf.mxu0 }
 0x136   :  { %1060 = vst [vmem:[#allocation2 + $0x38] sm:$0xff] %v983_v21 }
 0x137   :  { %v704_v25 = vpop.f32.mrf.mxu3 }
 0x138   :  { %v705_v60 = vadd.f32 %v704_v25, %v550_v41  ;;  %928 = vmatmul.f32.gmra.mxu0 %v1514_v24 }
 0x13a   :  { %v554_v0 = vpop.f32.mrf.mxu2  ;;  %v866_v26 = vadd.f32 %v865_v57, %v705_v60  ;;  %v986_v28 = vpop.f32.mrf.mxu1 }
 0x13b   :  { %v555_v63 = vadd.f32 %v554_v0, %v420_v43 }
 0x13c   :  { %v987_v39 = vadd.f32 %v986_v28, %v866_v26 }
 0x13d   :  { %1049 = vmatmul.f32.gmra.mxu1 %v1514_v24  ;;  %v869_v48 = vpop.f32.mrf.mxu0  ;;  %v239_v24 = vadd.f32 %v1586_v19, %v1714_v23  ;;  %v432_v23 = vadd.f32 %v1734_v40, %v247_v42 }
 0x13e   :  { %1061 = vst [vmem:[#allocation2 + $0x40] sm:$0xff] %v987_v39 }
 0x13f   :  { %v710_v1 = vpop.f32.mrf.mxu3  ;;  %v428_v17 = vadd.f32 %v1720_v30, %v239_v24 }
 0x140   :  { %v711_v6 = vadd.f32 %v710_v1, %v555_v63 }
 0x142   :  { %v559_v62 = vpop.f32.mrf.mxu2  ;;  %v870_v27 = vadd.f32 %v869_v48, %v711_v6  ;;  %v990_v61 = vpop.f32.mrf.mxu1 }
 0x143   :  { %v560_v36 = vadd.f32 %v559_v62, %v424_v37 }
 0x144   :  { %v991_v35 = vadd.f32 %v990_v61, %v870_v27 }
 0x145   :  { %v873_v7 = vpop.f32.mrf.mxu0 }
 0x146   :  { %1062 = vst [vmem:[#allocation2 + $0x48] sm:$0xff] %v991_v35 }
 0x147   :  { %v716_v5 = vpop.f32.mrf.mxu3 }
 0x148   :  { %v717_v34 = vadd.f32 %v716_v5, %v560_v36 }
 0x14a   :  { %v564_v14 = vpop.f32.mrf.mxu2  ;;  %v874_v47 = vadd.f32 %v873_v7, %v717_v34  ;;  %v994_v4 = vpop.f32.mrf.mxu1 }
 0x14b   :  { %v565_v9 = vadd.f32 %v564_v14, %v428_v17 }
 0x14c   :  { %v995_v11 = vadd.f32 %v994_v4, %v874_v47 }
 0x14d   :  { %v877_v18 = vpop.f32.mrf.mxu0 }
 0x14e   :  { %1063 = vst [vmem:[#allocation2 + $0x50] sm:$0xff] %v995_v11 }
 0x14f   :  { %v722_v33 = vpop.f32.mrf.mxu3 }
 0x150   :  { %v723_v52 = vadd.f32 %v722_v33, %v565_v9 }
 0x152   :  { %v569_v22 = vpop.f32.mrf.mxu2  ;;  %v878_v32 = vadd.f32 %v877_v18, %v723_v52  ;;  %v998_v31 = vpop.f32.mrf.mxu1 }
 0x153   :  { %v570_v53 = vadd.f32 %v569_v22, %v432_v23 }
 0x154   :  { %v999_v13 = vadd.f32 %v998_v31, %v878_v32 }
 0x155   :  { %v881_v56 = vpop.f32.mrf.mxu0 }
 0x156   :  { %1064 = vst [vmem:[#allocation2 + $0x58] sm:$0xff] %v999_v13 }
 0x157   :  { %v728_v16 = vpop.f32.mrf.mxu3 }
 0x158   :  { %v729_v30 = vadd.f32 %v728_v16, %v570_v53 }
 0x15a   :  { %v574_v45 = vpop.f32.mrf.mxu2  ;;  %v882_v20 = vadd.f32 %v881_v56, %v729_v30  ;;  %v1002_v58 = vpop.f32.mrf.mxu1  ;;  %v1880_v30 = vld [vmem:[#allocation5_spill] sm:$0xff] }
 0x15b   :  { %v575_v12 = vadd.f32 %v574_v45, %v1597_v2 }
 0x15c   :  { %v1003_v8 = vadd.f32 %v1002_v58, %v882_v20 }
 0x15d   :  { %v885_v51 = vpop.f32.mrf.mxu0 }
 0x15e   :  { %1065 = vst [vmem:[#allocation2 + $0x60] sm:$0xff] %v1003_v8 }
 0x15f   :  { %v734_v19 = vpop.f32.mrf.mxu3 }
 0x160   :  { %v735_v15 = vadd.f32 %v734_v19, %v575_v12 }
 0x162   :  { %v579_v38 = vpop.f32.mrf.mxu2  ;;  %v886_v10 = vadd.f32 %v885_v51, %v735_v15  ;;  %v1006_v21 = vpop.f32.mrf.mxu1  ;;  %v1881_v15 = vld [vmem:[#allocation6_spill] sm:$0xff] }
 0x163   :  { %v580_v57 = vadd.f32 %v579_v38, %v1609_v54 }
 0x164   :  { %v1007_v40 = vadd.f32 %v1006_v21, %v886_v10 }
 0x165   :  { %v889_v50 = vpop.f32.mrf.mxu0 }
 0x166   :  { %1066 = vst [vmem:[#allocation2 + $0x68] sm:$0xff] %v1007_v40 }
 0x167   :  { %v740_v41 = vpop.f32.mrf.mxu3 }
 0x168   :  { %v741_v25 = vadd.f32 %v740_v41, %v580_v57 }
 0x16a   :  { %v584_v44 = vpop.f32.mrf.mxu2  ;;  %v890_v60 = vadd.f32 %v889_v50, %v741_v25  ;;  %v1010_v0 = vpop.f32.mrf.mxu1  ;;  %v1882_v25 = vld [vmem:[#allocation7_spill] sm:$0xff] }
 0x16b   :  { %v585_v2 = vadd.f32 %v584_v44, %v1621_v29 }
 0x16c   :  { %v1011_v26 = vadd.f32 %v1010_v0, %v890_v60 }
 0x16d   :  { %v893_v28 = vpop.f32.mrf.mxu0 }
 0x16e   :  { %1067 = vst [vmem:[#allocation2 + $0x70] sm:$0xff] %v1011_v26 }
 0x16f   :  { %v746_v43 = vpop.f32.mrf.mxu3 }
 0x170   :  { %v747_v39 = vadd.f32 %v746_v43, %v585_v2 }
 0x172   :  { %v589_v48 = vpop.f32.mrf.mxu2  ;;  %v894_v63 = vadd.f32 %v893_v28, %v747_v39  ;;  %v1014_v1 = vpop.f32.mrf.mxu1 }
 0x173   :  { %v590_v54 = vadd.f32 %v589_v48, %v1633_v46  ;;  %v1883_v48 = vld [vmem:[#allocation8_spill] sm:$0xff] }
 0x174   :  { %v1015_v55 = vadd.f32 %v1014_v1, %v894_v63 }
 0x175   :  { %v897_v6 = vpop.f32.mrf.mxu0 }
 0x176   :  { %1068 = vst [vmem:[#allocation2 + $0x78] sm:$0xff] %v1015_v55 }
 0x177   :  { %v752_v62 = vpop.f32.mrf.mxu3 }
 0x178   :  { %v753_v27 = vadd.f32 %v752_v62, %v590_v54 }
 0x17a   :  { %v594_v61 = vpop.f32.mrf.mxu2  ;;  %v898_v37 = vadd.f32 %v897_v6, %v753_v27  ;;  %v1018_v35 = vpop.f32.mrf.mxu1 }
 0x17b   :  { %v595_v29 = vadd.f32 %v594_v61, %v1645_v59  ;;  %v1884_v61 = vld [vmem:[#allocation9_spill] sm:$0xff] }
 0x17c   :  { %v1019_v7 = vadd.f32 %v1018_v35, %v898_v37 }
 0x17d   :  { %v901_v36 = vpop.f32.mrf.mxu0 }
 0x17e   :  { %1069 = vst [vmem:[#allocation2 + $0x80] sm:$0xff] %v1019_v7 }
 0x17f   :  { %v758_v5 = vpop.f32.mrf.mxu3 }
 0x180   :  { %v759_v24 = vadd.f32 %v758_v5, %v595_v29 }
 0x182   :  { %v599_v34 = vpop.f32.mrf.mxu2  ;;  %v902_v14 = vadd.f32 %v901_v36, %v759_v24  ;;  %v1022_v47 = vpop.f32.mrf.mxu1 }
 0x183   :  { %v600_v46 = vadd.f32 %v599_v34, %v1657_v3 }
 0x184   :  { %v1023_v4 = vadd.f32 %v1022_v47, %v902_v14 }
 0x185   :  { %v905_v17 = vpop.f32.mrf.mxu0 }
 0x186   :  { %1070 = vst [vmem:[#allocation2 + $0x88] sm:$0xff] %v1023_v4 }
 0x187   :  { %v764_v11 = vpop.f32.mrf.mxu3 }
 0x188   :  { %v765_v18 = vadd.f32 %v764_v11, %v600_v46 }
 0x18a   :  { %v604_v9 = vpop.f32.mrf.mxu2  ;;  %v906_v33 = vadd.f32 %v905_v17, %v765_v18  ;;  %v1026_v42 = vpop.f32.mrf.mxu1 }
 0x18b   :  { %v605_v59 = vadd.f32 %v604_v9, %v1669_v49 }
 0x18c   :  { %v1027_v52 = vadd.f32 %v1026_v42, %v906_v33 }
 0x18d   :  { %v909_v22 = vpop.f32.mrf.mxu0 }
 0x18e   :  { %1071 = vst [vmem:[#allocation2 + $0x90] sm:$0xff] %v1027_v52 }
 0x18f   :  { %v770_v32 = vpop.f32.mrf.mxu3 }
 0x190   :  { %v771_v31 = vadd.f32 %v770_v32, %v605_v59 }
 0x192   :  { %v609_v23 = vpop.f32.mrf.mxu2  ;;  %v910_v13 = vadd.f32 %v909_v22, %v771_v31  ;;  %v1030_v56 = vpop.f32.mrf.mxu1 }
 0x193   :  { %v610_v3 = vadd.f32 %v609_v23, %v1880_v30 }
 0x194   :  { %v1031_v53 = vadd.f32 %v1030_v56, %v910_v13 }
 0x195   :  { %v913_v16 = vpop.f32.mrf.mxu0 }
 0x196   :  { %1072 = vst [vmem:[#allocation2 + $0x98] sm:$0xff] %v1031_v53 }
 0x197   :  { %v776_v45 = vpop.f32.mrf.mxu3 }
 0x198   :  { %v777_v20 = vadd.f32 %v776_v45, %v610_v3 }
 0x19a   :  { %v614_v58 = vpop.f32.mrf.mxu2  ;;  %v914_v8 = vadd.f32 %v913_v16, %v777_v20  ;;  %v1034_v51 = vpop.f32.mrf.mxu1 }
 0x19b   :  { %v615_v49 = vadd.f32 %v614_v58, %v1881_v15 }
 0x19c   :  { %v1035_v12 = vadd.f32 %v1034_v51, %v914_v8 }
 0x19d   :  { %v917_v19 = vpop.f32.mrf.mxu0 }
 0x19e   :  { %1073 = vst [vmem:[#allocation2 + $0xa0] sm:$0xff] %v1035_v12 }
 0x19f   :  { %v782_v38 = vpop.f32.mrf.mxu3 }
 0x1a0   :  { %v783_v10 = vadd.f32 %v782_v38, %v615_v49 }
 0x1a2   :  { %v619_v21 = vpop.f32.mrf.mxu2  ;;  %v918_v40 = vadd.f32 %v917_v19, %v783_v10  ;;  %v1038_v50 = vpop.f32.mrf.mxu1 }
 0x1a3   :  { %v620_v44 = vadd.f32 %v619_v21, %v1882_v25 }
 0x1a4   :  { %v1039_v57 = vadd.f32 %v1038_v50, %v918_v40 }
 0x1a5   :  { %v921_v41 = vpop.f32.mrf.mxu0 }
 0x1a6   :  { %1074 = vst [vmem:[#allocation2 + $0xa8] sm:$0xff] %v1039_v57 }
 0x1a7   :  { %v788_v60 = vpop.f32.mrf.mxu3 }
 0x1a8   :  { %v789_v0 = vadd.f32 %v788_v60, %v620_v44 }
 0x1aa   :  { %v624_v26 = vpop.f32.mrf.mxu2  ;;  %v922_v28 = vadd.f32 %v921_v41, %v789_v0  ;;  %v1042_v2 = vpop.f32.mrf.mxu1 }
 0x1ab   :  { %v625_v63 = vadd.f32 %v624_v26, %v1883_v48 }
 0x1ac   :  { %v1043_v43 = vadd.f32 %v1042_v2, %v922_v28 }
 0x1ad   :  { %v925_v39 = vpop.f32.mrf.mxu0 }
 0x1ae   :  { %1075 = vst [vmem:[#allocation2 + $0xb0] sm:$0xff] %v1043_v43 }
 0x1af   :  { %v794_v1 = vpop.f32.mrf.mxu3 }
 0x1b0   :  { %v795_v55 = vadd.f32 %v794_v1, %v625_v63 }
 0x1b2   :  { %v926_v6 = vadd.f32 %v925_v39, %v795_v55  ;;  %v1046_v54 = vpop.f32.mrf.mxu1  ;;  %v629_v62 = vpop.f32.mrf.mxu2 }
 0x1b3   :  { %v630_v37 = vadd.f32 %v629_v62, %v1884_v61 }
 0x1b4   :  { %v1047_v27 = vadd.f32 %v1046_v54, %v926_v6 }
 0x1b5   :  { %v929_v7 = vpop.f32.mrf.mxu0 }
 0x1b6   :  { %1076 = vst [vmem:[#allocation2 + $0xb8] sm:$0xff] %v1047_v27 }
 0x1b7   :  { %v800_v35 = vpop.f32.mrf.mxu3 }
 0x1b8   :  { %v801_v36 = vadd.f32 %v800_v35, %v630_v37 }
 0x1ba   :  { %v930_v29 = vadd.f32 %v929_v7, %v801_v36  ;;  %v1050_v5 = vpop.f32.mrf.mxu1 }
 0x1bc   :  { %v1051_v24 = vadd.f32 %v1050_v5, %v930_v29 }
 0x1be   :  { %1077 = vst [vmem:[#allocation2 + $0xc0] sm:$0xff] %v1051_v24 }
 0x1bf   :  { %1090 = dma.vmem_to_hbm [thread:$0]  %s1083_s15, 3200, %s1085_s18, [#allocation3], %s1135_s19, %s1135_s19, %s1136_s20  }
 0x1c0   :  { %1132 = dma.done.wait [#allocation3], 3200  }
 0x1c1   :  { %1133 = vsyncadd [#allocation3], 4294964096 }
 0x1c2   :  { %1095 = vsyncpa [#allocation3], 1 }

</bundles_post_ra>
